<compile_context>
chip_gen: v7x
topology: tpu7x:2x2x1
jax: 0.10.0
libtpu: 0.0.40
codegen_flags: <defaults>
</compile_context>

<pallas_src>
import functools

import jax
import jax.numpy as jnp
from jax.experimental import pallas as pl
from jax.experimental.pallas import tpu as pltpu

BN_EPS = 1e-5


# ----------------------------------------------------------------------------
# Hardware queries (best-effort; conservative defaults if unavailable).
# ----------------------------------------------------------------------------
def _tpu_vmem_bytes():
    try:
        info = pltpu.get_tpu_info()
        v = getattr(info, "vmem_capacity_bytes", None)
        if v:
            return int(v)
    except Exception:
        pass
    return 64 << 20  # v7x-sized: safe lower bound across generations


def _num_tensorcores():
    try:
        kind = jax.devices()[0].device_kind.lower()
        if "v7" in kind or "7x" in kind:
            return 2
    except Exception:
        pass
    return 1


def _step_bytes(bb, T, D, L):
    """Rough VMEM working set of one grid step (double-buffered x/strong +
    logits/sigmoid/softmax temporaries)."""
    xblk = bb * T * D * 4
    sblk = bb * L * T * 4
    tmp = 4 * bb * T * (2 * L) * 4
    return 2 * xblk + 2 * sblk + tmp


def _choose_blocking(B, T, D, L, vmem_bytes, n_cores):
    """Return (bb, resident). Blocks are sized by bytes, not by MXU rows."""
    budget = int(0.55 * vmem_bytes)
    if _step_bytes(B, T, D, L) <= budget:
        return B, True                      # whole input resident: 1 grid step

    target = 4 << 20                        # aim ~4 MiB of x per step
    best = None
    for bb in range(1, B):
        if B % bb:
            continue
        if (bb * T) % 8:                    # keep the 2-D x block sublane-legal
            continue
        if _step_bytes(bb, T, D, L) > budget:
            continue
        nsteps = B // bb
        if n_cores > 1 and (nsteps < n_cores or nsteps % n_cores):
            continue                        # keep both v7x TensorCores busy
        xblk = bb * T * D * 4
        score = (xblk >= (2 << 20),         # prefer >= 2 MiB blocks
                 (bb * T) % 256 == 0,       # fill the 2x256 MXU M dimension
                 -abs(xblk - target))       # aim ~4 MiB
        if best is None or score > best[1]:
            best = (bb, score)
    if best is None:
        # No legal streamed tiling for this (B, T); fall back to one resident
        # block.  TODO(synk): pathological shapes may spill here; a row-tiled
        # two-phase (stats + matmul) grid would be needed.
        return B, True
    return best[0], False


# ----------------------------------------------------------------------------
# Kernel
# ----------------------------------------------------------------------------
def _linear_head_kernel(x_ref, wc_ref, bc_ref, strong_ref, weak_ref, *,
                        num_labels, bb, t, compute_stats):
    """One grid step handles `bb` batch elements.

    x_ref:      (bb*T, D)   raw rows (streamed path: BN already folded into wc/bc)
    wc_ref:     (D, 2L)     [w_strong/temp | w_softmax]
    bc_ref:     (1, 2L)     [b_strong/temp | b_softmax]
    strong_ref: (bb, L, T)  sigmoid branch, lane-dense in T
    weak_ref:   (bb, 1, L)  softmax-weighted time pooling
    """
    L = num_labels
    x = x_ref[...]                                              # (bb*T, D) f32

    if compute_stats:
        # Resident path: the whole (B*T, D) input sits in VMEM for this single
        # grid step, so BatchNorm batch statistics come from the same copy
        # (no second HBM pass) with the numerically stable two-pass formula.
        inv_n = 1.0 / float(bb * t)
        mean = jnp.sum(x, axis=0, keepdims=True) * inv_n        # (1, D)
        cent = x - mean
        var = jnp.sum(cent * cent, axis=0, keepdims=True) * inv_n
        x = cent * jax.lax.rsqrt(var + BN_EPS)

    # One fused MXU matmul for both heads.
    logits = jnp.dot(x, wc_ref[...],
                     preferred_element_type=jnp.float32) + bc_ref[...]  # (bb*T, 2L)

    strong = jax.nn.sigmoid(logits[:, :L])                      # temp folded in
    soft = jnp.clip(jax.nn.softmax(logits[:, L:], axis=-1), 1e-7, 1.0)

    strong3 = strong.reshape(bb, t, L)                          # (bb, T, L)
    soft3 = soft.reshape(bb, t, L)

    # Batched time pooling (no per-batch unrolled loop). Divide goes through
    # the EUP reciprocal; one Newton step restores ~f32 accuracy for free.
    num = jnp.sum(strong3 * soft3, axis=1)                      # (bb, L)
    den = jnp.sum(soft3, axis=1)                                # (bb, L)
    r = pl.reciprocal(den, approx=True)
    r = r * (2.0 - den * r)
    weak_ref[...] = (num * r).reshape(bb, 1, L)

    # One batched lane-aware transpose + unmasked lane-dense (T last) store.
    strong_ref[...] = pltpu.einshape("btl->blt", strong3)       # (bb, L, T)


# ----------------------------------------------------------------------------
# Wrapper
# ----------------------------------------------------------------------------
def linear_head_forward(x, w1, b1, w2, b2, temp=1.0, use_norm=True,
                        block_batch=None):
    """x: (B, T, D) f32; w1/w2: (D, L); b1/b2: (1, L).
    Returns (strong (B, L, T), weak (B, L))."""
    B, T, D = x.shape
    L = w1.shape[1]

    vmem = _tpu_vmem_bytes()
    n_cores = _num_tensorcores()
    if block_batch is None:
        bb, resident = _choose_blocking(B, T, D, L, vmem, n_cores)
    else:
        bb = int(block_batch)
        assert B % bb == 0, "block_batch must divide B"
        resident = (bb == B)
        assert resident or (bb * T) % 8 == 0, "bb*T must be sublane-aligned"

    need = _step_bytes(bb if not resident else B, T, D, L)
    vmem_limit = int(min(0.85 * vmem, max(need + (8 << 20), 32 << 20)))

    # Fold 1/temp into the strong head (data-independent).
    inv_temp = jnp.float32(1.0 / float(temp))
    wcat = jnp.concatenate([w1 * inv_temp, w2], axis=1).astype(jnp.float32)  # (D, 2L)
    bcat = jnp.concatenate([b1 * inv_temp, b2], axis=1).astype(jnp.float32)  # (1, 2L)

    if use_norm and not resident:
        # Streamed path: stable two-pass batch statistics in XLA, folded into
        # the linears so the kernel reads x from HBM exactly once per step.
        # xn @ W + b == x @ (invstd[:,None]*W) + (b - (mean*invstd) @ W)
        mean = jnp.mean(x, axis=(0, 1))
        var = jnp.mean(jnp.square(x - mean), axis=(0, 1))   # biased, like BN training
        invstd = jax.lax.rsqrt(var + BN_EPS)
        bcat = bcat - (mean * invstd)[None, :] @ wcat
        wcat = wcat * invstd[:, None]

    x2d = x.reshape(B * T, D)   # free row-major reshape; kernel never reshapes x

    kernel = functools.partial(_linear_head_kernel, num_labels=L, bb=bb, t=T,
                               compute_stats=bool(use_norm and resident))

    cost = pl.CostEstimate(
        flops=2 * B * T * D * (2 * L) + 10 * B * T * L,
        transcendentals=2 * B * T * L,
        bytes_accessed=4 * (B * T * D + D * 2 * L + 2 * L + B * L * T + B * L),
    )

    # TODO(synk): bf16 x / weights (keeping f32 accumulation) would halve HBM
    # traffic on v6e/v7x if the upstream backbone can provide bf16 activations.
    # TODO(synk): on v7x, pltpu.CORE_PARALLEL on this axis may shard across the
    # two TensorCores more explicitly than "parallel".
    strong, weak3 = pl.pallas_call(
        kernel,
        out_shape=(
            jax.ShapeDtypeStruct((B, L, T), jnp.float32),
            jax.ShapeDtypeStruct((B, 1, L), jnp.float32),
        ),
        grid_spec=pltpu.PrefetchScalarGridSpec(
            num_scalar_prefetch=0,
            grid=(B // bb,),
            in_specs=[
                pl.BlockSpec((bb * T, D), lambda g: (g, 0)),       # x rows
                pl.BlockSpec((D, 2 * L), lambda g: (0, 0)),        # fused weights
                pl.BlockSpec((1, 2 * L), lambda g: (0, 0)),        # fused biases
            ],
            out_specs=[
                pl.BlockSpec((bb, L, T), lambda g: (g, 0, 0)),     # strong (B,L,T)
                pl.BlockSpec((bb, 1, L), lambda g: (g, 0, 0)),     # weak  (B,1,L)
            ],
        ),
        compiler_params=pltpu.CompilerParams(
            dimension_semantics=("parallel",),
            vmem_limit_bytes=vmem_limit,
        ),
        cost_estimate=cost,
    )(x2d, wcat, bcat)

    return strong, weak3.reshape(B, L)


# ----------------------------------------------------------------------------
# Pure-JAX reference (mirrors the PyTorch module)
# ----------------------------------------------------------------------------
def _reference(x, w1, b1, w2, b2, temp=1.0, use_norm=True):
    if use_norm:
        mean = jnp.mean(x, axis=(0, 1))
        var = jnp.mean((x - mean) ** 2, axis=(0, 1))
        x = (x - mean) / jnp.sqrt(var + BN_EPS)
    strong = jax.nn.sigmoid((x @ w1 + b1) / temp)
    soft = jnp.clip(jax.nn.softmax(x @ w2 + b2, axis=-1), 1e-7, 1.0)
    weak = jnp.sum(strong * soft, axis=1) / jnp.sum(soft, axis=1)
    return jnp.transpose(strong, (0, 2, 1)), weak


if __name__ == "__main__":
    key = jax.random.PRNGKey(0)
    k_x, k_w1, k_w2, k_x2 = jax.random.split(key, 4)

    D, L = 32, 16
    # nn.Linear weights ~ N(0, 0.01), biases zero. PyTorch stores (L, D);
    # kernel uses the (D, L) layout (x @ W).
    w1 = (0.01 * jax.random.normal(k_w1, (L, D), dtype=jnp.float32)).T
    b1 = jnp.zeros((1, L), dtype=jnp.float32)
    w2 = (0.01 * jax.random.normal(k_w2, (L, D), dtype=jnp.float32)).T
    b2 = jnp.zeros((1, L), dtype=jnp.float32)

    # --- resident single-step path: BN batch stats computed in-kernel --------
    B, T = 2, 16
    x = jax.random.normal(k_x, (B, T, D), dtype=jnp.float32)
    strong, weak = linear_head_forward(x, w1, b1, w2, b2, temp=1.0)
    jax.block_until_ready((strong, weak))
    rs, rw = _reference(x, w1, b1, w2, b2, temp=1.0)
    assert strong.shape == (B, L, T) and weak.shape == (B, L)
    assert jnp.allclose(strong, rs, atol=1e-5, rtol=1e-5)
    assert jnp.allclose(weak, rw, atol=1e-4, rtol=1e-4)

    # --- streamed multi-step path: BN folded into weights, bb=2 per step -----
    B2, T2 = 8, 16
    x2 = jax.random.normal(k_x2, (B2, T2, D), dtype=jnp.float32)
    strong2, weak2 = linear_head_forward(x2, w1, b1, w2, b2, temp=2.0,
                                         block_batch=2)
    jax.block_until_ready((strong2, weak2))
    rs2, rw2 = _reference(x2, w1, b1, w2, b2, temp=2.0)
    assert strong2.shape == (B2, L, T2) and weak2.shape == (B2, L)
    assert jnp.allclose(strong2, rs2, atol=1e-5, rtol=1e-5)
    assert jnp.allclose(weak2, rw2, atol=1e-4, rtol=1e-4)

    print("KERNEL_OK")
</pallas_src>

<mosaic_0001>
module attributes {stable_mosaic.version = 11 : i64} {
  func.func @_linear_head_kernel(%arg0: i32, %arg1: memref<32x32xf32, #tpu.memory_space<vmem>>, %arg2: memref<32x32xf32, #tpu.memory_space<vmem>>, %arg3: memref<1x32xf32, #tpu.memory_space<vmem>>, %arg4: memref<2x16x16xf32, #tpu.memory_space<vmem>>, %arg5: memref<2x1x16xf32, #tpu.memory_space<vmem>>) attributes {dimension_semantics = [#tpu.dimension_semantics<parallel>], iteration_bounds = array<i64: 1>, scalar_prefetch = 0 : i64, scratch_operands = 0 : i64, tpu.core_type = #tpu.core_type<tc>, window_params = [{transform_indices = @transform_0, window_bounds = array<i64: 32, 32>}, {pipeline_mode = #tpu.pipeline_mode<synchronous>, transform_indices = @transform_1, window_bounds = array<i64: 32, 32>}, {pipeline_mode = #tpu.pipeline_mode<synchronous>, transform_indices = @transform_2, window_bounds = array<i64: 1, 32>}, {transform_indices = @transform_3, window_bounds = array<i64: 2, 16, 16>}, {transform_indices = @transform_4, window_bounds = array<i64: 2, 1, 16>}]} {
    %c0 = arith.constant 0 : index
    %c0_0 = arith.constant 0 : index
    %0 = vector.load %arg1[%c0, %c0_0] : memref<32x32xf32, #tpu.memory_space<vmem>>, vector<32x32xf32>
    %cst = arith.constant dense<0.000000e+00> : vector<32xf32>
    %1 = vector.multi_reduction <add>, %0, %cst [0] : vector<32x32xf32> to vector<32xf32>
    %2 = vector.shape_cast %1 : vector<32xf32> to vector<1x32xf32>
    %cst_1 = arith.constant 3.125000e-02 : f32
    %3 = vector.broadcast %cst_1 : f32 to vector<1x32xf32>
    %4 = arith.mulf %2, %3 : vector<1x32xf32>
    %5 = vector.broadcast %4 : vector<1x32xf32> to vector<32x32xf32>
    %6 = arith.subf %0, %5 : vector<32x32xf32>
    %7 = arith.mulf %6, %6 : vector<32x32xf32>
    %cst_2 = arith.constant dense<0.000000e+00> : vector<32xf32>
    %8 = vector.multi_reduction <add>, %7, %cst_2 [0] : vector<32x32xf32> to vector<32xf32>
    %9 = vector.shape_cast %8 : vector<32xf32> to vector<1x32xf32>
    %cst_3 = arith.constant 3.125000e-02 : f32
    %10 = vector.broadcast %cst_3 : f32 to vector<1x32xf32>
    %11 = arith.mulf %9, %10 : vector<1x32xf32>
    %cst_4 = arith.constant 9.99999974E-6 : f32
    %12 = vector.broadcast %cst_4 : f32 to vector<1x32xf32>
    %13 = arith.addf %11, %12 : vector<1x32xf32>
    %14 = math.rsqrt %13 : vector<1x32xf32>
    %15 = vector.broadcast %14 : vector<1x32xf32> to vector<32x32xf32>
    %16 = arith.mulf %6, %15 : vector<32x32xf32>
    %c0_5 = arith.constant 0 : index
    %c0_6 = arith.constant 0 : index
    %17 = vector.load %arg2[%c0_5, %c0_6] : memref<32x32xf32, #tpu.memory_space<vmem>>, vector<32x32xf32>
    %cst_7 = arith.constant dense<0.000000e+00> : vector<32x32xf32>
    %18 = tpu.matmul %16, %17, %cst_7 {dimension_numbers = #tpu.dot_dimension_numbers<[1], [0], [0], [1], [0, 0, 1, 1], [], []>} : vector<32x32xf32>, vector<32x32xf32>, vector<32x32xf32> -> vector<32x32xf32>
    %c0_8 = arith.constant 0 : index
    %c0_9 = arith.constant 0 : index
    %19 = vector.load %arg3[%c0_8, %c0_9] : memref<1x32xf32, #tpu.memory_space<vmem>>, vector<1x32xf32>
    %20 = vector.broadcast %19 : vector<1x32xf32> to vector<32x32xf32>
    %21 = arith.addf %18, %20 : vector<32x32xf32>
    %22 = vector.extract_strided_slice %21 {offsets = [0, 0], sizes = [32, 16], strides = [1, 1]} : vector<32x32xf32> to vector<32x16xf32>
    %23 = arith.negf %22 : vector<32x16xf32>
    %24 = math.exp %23 : vector<32x16xf32>
    %cst_10 = arith.constant 1.000000e+00 : f32
    %25 = vector.broadcast %cst_10 : f32 to vector<32x16xf32>
    %26 = arith.addf %25, %24 : vector<32x16xf32>
    %27 = arith.divf %25, %26 : vector<32x16xf32>
    %28 = vector.extract_strided_slice %21 {offsets = [0, 16], sizes = [32, 16], strides = [1, 1]} : vector<32x32xf32> to vector<32x16xf32>
    %cst_11 = arith.constant dense<0xFF800000> : vector<32xf32>
    %29 = vector.multi_reduction <maximumf>, %28, %cst_11 [1] : vector<32x16xf32> to vector<32xf32>
    %cst_12 = arith.constant 0xFF800000 : f32
    %30 = vector.broadcast %cst_12 : f32 to vector<32xf32>
    %31 = arith.maximumf %30, %29 : vector<32xf32>
    %32 = vector.shape_cast %31 : vector<32xf32> to vector<32x1xf32>
    %33 = vector.broadcast %32 : vector<32x1xf32> to vector<32x16xf32>
    %34 = arith.subf %28, %33 : vector<32x16xf32>
    %35 = math.exp %34 : vector<32x16xf32>
    %cst_13 = arith.constant dense<0.000000e+00> : vector<32xf32>
    %36 = vector.multi_reduction <add>, %35, %cst_13 [1] : vector<32x16xf32> to vector<32xf32>
    %37 = vector.shape_cast %36 : vector<32xf32> to vector<32x1xf32>
    %38 = vector.broadcast %37 : vector<32x1xf32> to vector<32x16xf32>
    %39 = arith.divf %35, %38 : vector<32x16xf32>
    %cst_14 = arith.constant 1.000000e-07 : f32
    %cst_15 = arith.constant 1.000000e+00 : f32
    %40 = vector.broadcast %cst_14 : f32 to vector<32x16xf32>
    %41 = arith.maximumf %40, %39 : vector<32x16xf32>
    %42 = vector.broadcast %cst_15 : f32 to vector<32x16xf32>
    %43 = arith.minimumf %42, %41 : vector<32x16xf32>
    %44 = vector.shape_cast %27 : vector<32x16xf32> to vector<2x16x16xf32>
    %45 = vector.shape_cast %43 : vector<32x16xf32> to vector<2x16x16xf32>
    %46 = arith.mulf %44, %45 : vector<2x16x16xf32>
    %cst_16 = arith.constant dense<0.000000e+00> : vector<2x16xf32>
    %47 = vector.multi_reduction <add>, %46, %cst_16 [1] : vector<2x16x16xf32> to vector<2x16xf32>
    %cst_17 = arith.constant dense<0.000000e+00> : vector<2x16xf32>
    %48 = vector.multi_reduction <add>, %45, %cst_17 [1] : vector<2x16x16xf32> to vector<2x16xf32>
    %49 = tpu.reciprocal %48 {approx = true} : vector<2x16xf32> -> vector<2x16xf32>
    %50 = arith.mulf %48, %49 : vector<2x16xf32>
    %cst_18 = arith.constant 2.000000e+00 : f32
    %51 = vector.broadcast %cst_18 : f32 to vector<2x16xf32>
    %52 = arith.subf %51, %50 : vector<2x16xf32>
    %53 = arith.mulf %49, %52 : vector<2x16xf32>
    %54 = arith.mulf %47, %53 : vector<2x16xf32>
    %55 = vector.shape_cast %54 : vector<2x16xf32> to vector<2x1x16xf32>
    %c0_19 = arith.constant 0 : index
    %c0_20 = arith.constant 0 : index
    %c0_21 = arith.constant 0 : index
    %56 = vector.load %arg5[%c0_19, %c0_20, %c0_21] : memref<2x1x16xf32, #tpu.memory_space<vmem>>, vector<2x1x16xf32>
    tpu.vector_store %arg5[%c0_19, %c0_20, %c0_21], %55 {strides = array<i32>} : memref<2x1x16xf32, #tpu.memory_space<vmem>>, vector<2x1x16xf32>,
    %57 = tpu.transpose %44, [0, 2, 1] : vector<2x16x16xf32> -> vector<2x16x16xf32>
    %c0_22 = arith.constant 0 : index
    %c0_23 = arith.constant 0 : index
    %c0_24 = arith.constant 0 : index
    %58 = vector.load %arg4[%c0_22, %c0_23, %c0_24] : memref<2x16x16xf32, #tpu.memory_space<vmem>>, vector<2x16x16xf32>
    tpu.vector_store %arg4[%c0_22, %c0_23, %c0_24], %57 {strides = array<i32>} : memref<2x16x16xf32, #tpu.memory_space<vmem>>, vector<2x16x16xf32>,
    return
  }
  func.func @transform_0(%arg0: i32) -> (i32, i32) {
    %c0_i32 = arith.constant 0 : i32
    %c0_i32_0 = arith.constant 0 : i32
    return %arg0, %c0_i32 : i32, i32
  }
  func.func @transform_1(%arg0: i32) -> (i32, i32) {
    %c0_i32 = arith.constant 0 : i32
    %c0_i32_0 = arith.constant 0 : i32
    %c0_i32_1 = arith.constant 0 : i32
    return %c0_i32, %c0_i32_0 : i32, i32
  }
  func.func @transform_2(%arg0: i32) -> (i32, i32) {
    %c0_i32 = arith.constant 0 : i32
    %c0_i32_0 = arith.constant 0 : i32
    %c0_i32_1 = arith.constant 0 : i32
    return %c0_i32, %c0_i32_0 : i32, i32
  }
  func.func @transform_3(%arg0: i32) -> (i32, i32, i32) {
    %c0_i32 = arith.constant 0 : i32
    %c0_i32_0 = arith.constant 0 : i32
    %c0_i32_1 = arith.constant 0 : i32
    return %arg0, %c0_i32, %c0_i32_0 : i32, i32, i32
  }
  func.func @transform_4(%arg0: i32) -> (i32, i32, i32) {
    %c0_i32 = arith.constant 0 : i32
    %c0_i32_0 = arith.constant 0 : i32
    %c0_i32_1 = arith.constant 0 : i32
    return %arg0, %c0_i32, %c0_i32_0 : i32, i32, i32
  }
}

</mosaic_0001>

<bundles_post_ra>
// kernel: tpu_custom_call.1
= control target key start
LH: loop header
LB: loop body
LE: loop exit
PB: predicated region body
PF: predicated region fallthrough
CT: control target
= control target key end

     0   :  { %10 = vsyncpa [#allocation3], 0  ;;  %s817_s0 = inlined_call_operand.hbm [shape: f32[32,32], index: 0, kind: input, shape index: {}]   ;;  %s818_s1 = inlined_call_operand.hbm [shape: f32[32,32], index: 1, kind: input, shape index: {}]   ;;  %s819_s2 = inlined_call_operand.vmem [shape: f32[1,32], index: 2, kind: input, shape index: {}]   ;;  %s820_s3 = inlined_call_operand.hbm [shape: f32[2,16,16], index: 3, kind: output, shape index: {0}]   ;;  %s821_s4 = inlined_call_operand.hbm [shape: f32[2,1,16], index: 4, kind: output, shape index: {1}]  }
   0x1   :  { %11 = vsyncpa [#allocation6], 0 }
   0x2   :  { %12 = vsyncpa [#allocation4], 0 }
   0x3   :  { %13 = vsyncpa [#allocation9], 0  ;;  %s661_s15 = smov [#allocation2]   ;;  %s565_s19 = scalar_lea.hbm %s817_s0, 512 }
   0x4   :  { %s19_s16 = sshll.u32 %s661_s15, 4  ;;  %p566_p0 = scmp.ne.s32.totalorder %s817_s0, %s565_s19  ;;  %s20_s16 = int_to_ptr.vmem [resolvable:$true] %s19_s16 }
   0x5   :  { %p569_p1 = scmp.lt.u32.totalorder %s565_s19, %s817_s0 }
   0x7   :  { %p571_p2 = pnand %p569_p1, %p566_p0 }
   0x9   :  { %574 = shalt.err (!%p571_p2)
}
   0xa   :  { %s575_s24 = scalar_lea.vmem %s20_s16, 512  ;;  %p580_p4 = scmp.lt.s32.totalorder %s20_s16, %s20_s16 }
   0xb   :  { %p576_p3 = scmp.ne.s32.totalorder %s20_s16, %s575_s24  ;;  %p581_p5 = scmp.lt.s32.totalorder %s575_s24, %s575_s24 }
   0xd   :  { %p582_p6 = por %p581_p5, %p580_p4 }
   0xf   :  { %p583_p7 = pnand %p582_p6, %p576_p3 }
  0x11   :  { %586 = shalt.err (!%p583_p7)
}
  0x12   :  { %s662_s25 = smov 128   ;;  %s663_s26 = smov 8  }
  0x13   :  { %25 = dma.hbm_to_vmem [thread:$0]  %s817_s0, 512, %s20_s16, [#allocation3], %s662_s25, %s662_s25, %s663_s26  }
  0x14   :  { %s664_s29 = smov [#allocation5]   ;;  %s587_s7 = scalar_lea.hbm %s818_s1, 512 }
  0x15   :  { %s31_s30 = sshll.u32 %s664_s29, 4  ;;  %p588_p8 = scmp.ne.s32.totalorder %s818_s1, %s587_s7  ;;  %s32_s30 = int_to_ptr.vmem [resolvable:$true] %s31_s30 }
  0x16   :  { %p591_p9 = scmp.lt.u32.totalorder %s587_s7, %s818_s1 }
  0x18   :  { %p593_p10 = pnand %p591_p9, %p588_p8 }
  0x1a   :  { %596 = shalt.err (!%p593_p10)
}
  0x1b   :  { %s597_s12 = scalar_lea.vmem %s32_s30, 512  ;;  %p602_p12 = scmp.lt.s32.totalorder %s32_s30, %s32_s30 }
  0x1c   :  { %p598_p11 = scmp.ne.s32.totalorder %s32_s30, %s597_s12  ;;  %p603_p13 = scmp.lt.s32.totalorder %s597_s12, %s597_s12 }
  0x1e   :  { %p604_p0 = por %p603_p13, %p602_p12 }
  0x20   :  { %p605_p1 = pnand %p604_p0, %p598_p11 }
  0x22   :  { %608 = shalt.err (!%p605_p1)
}
  0x23   :  { %37 = dma.hbm_to_vmem [thread:$0]  %s818_s1, 512, %s32_s30, [#allocation6], %s662_s25, %s662_s25, %s663_s26  }
  0x24   :  { %653 = dma.done.wait [#allocation3], 512  }
  0x25   :  { %654 = vsyncadd [#allocation3], 4294966784 }
  0x26   :  { %655 = dma.done.wait [#allocation6], 512  }
  0x27   :  { %656 = vsyncadd [#allocation6], 4294966784  ;;  %vm50_vm0 = vcmask 261120   ;;  %v93_v0 = vld [vmem:[#allocation5] sm:$0xff]  ;;  %v94_v1 = vld [vmem:[#allocation5 + $0x8] sm:$0xff]  ;;  %vm225_vm1 = vcmask 261248  }
  0x28   :  { %v95_v2 = vld [vmem:[#allocation5 + $0x10] sm:$0xff]  ;;  %v505_v3 = vpack.c.bf16 %v94_v1, %v93_v0  ;;  %v96_v4 = vld [vmem:[#allocation5 + $0x18] sm:$0xff]  ;;  %v46_v5 = vld [vmem:[#allocation2] sm:$0xff]  ;;  %vm266_vm2 = vcmask 130048   ;;  %vm369_vm3 = vcmask 122880   ;;  %s666_s15 = smov [#allocation8]  }
  0x29   :  { %v47_v6 = vld [vmem:[#allocation2 + $0x8] sm:$0xff]  ;;  %v509_v7 = vpack.c.bf16 %v96_v4, %v95_v2  ;;  %v48_v8 = vld [vmem:[#allocation2 + $0x10] sm:$0xff]  ;;  %v49_v9 = vld [vmem:[#allocation2 + $0x18] sm:$0xff]  ;;  %v51_v10 = vsel %vm50_vm0, %v46_v5, 0.0  ;;  %s457_s16 = sshll.u32 %s666_s15, 4  ;;  %s458_s16 = int_to_ptr.vmem [resolvable:$true] %s457_s16 }
  0x2a   :  { %v52_v11 = vsel %vm50_vm0, %v47_v6, 0.0  ;;  %506 = vmatprep.subr.bf16.mxu0 %v505_v3  ;;  %513 = vmatprep.subr.bf16.mxu1 %v505_v3  ;;  %v54_v13 = vsel %vm50_vm0, %v48_v8, 0.0  ;;  %v56_v14 = vsel %vm50_vm0, %v49_v9, 0.0  ;;  %v474_v52 = vld [vmem:[%s819_s2] ss:$0 sm:$0xff]  ;;  %s665_s2 = smov 112   ;;  %p614_p3 = scmp.lt.s32.totalorder %s458_s16, %s458_s16 }
  0x2b   :  { %v53_v12 = vadd.f32 %v52_v11, %v51_v10  ;;  %508 = vmatpush3.bf16.msra.mxu0 %v505_v3  ;;  %515 = vmatpush3.bf16.msra.mxu1 %v505_v3  ;;  %s609_s17 = scalar_lea.vmem %s458_s16, 32 }
  0x2c   :  { %510 = vmatprep.subr.bf16.mxu0 %v509_v7  ;;  %514 = vmatprep.subr.bf16.mxu1 %v509_v7  ;;  %p610_p2 = scmp.ne.s32.totalorder %s458_s16, %s609_s17  ;;  %p615_p4 = scmp.lt.s32.totalorder %s609_s17, %s609_s17 }
  0x2d   :  { %v55_v15 = vadd.f32 %v54_v13, %v53_v12 }
  0x2e   :  { %p616_p5 = por %p615_p4, %p614_p3 }
  0x2f   :  { %v57_v16 = vadd.f32 %v56_v14, %v55_v15  ;;  %512 = vmatpush3.bf16.msra.mxu0 %v509_v7  ;;  %516 = vmatpush3.bf16.msra.mxu1 %v509_v7 }
  0x30   :  { %p617_p6 = pnand %p616_p5, %p610_p2 }
  0x31   :  { %v58_v17 = vrot.slane %v57_v16, 4 }
  0x33   :  { %v59_v18 = vadd.f32 %v58_v17, %v57_v16 }
  0x35   :  { %v60_v19 = vrot.slane %v59_v18, 2 }
  0x37   :  { %v61_v20 = vadd.f32 %v60_v19, %v59_v18 }
  0x39   :  { %v62_v21 = vrot.slane %v61_v20, 1 }
  0x3b   :  { %v63_v22 = vadd.f32 %v62_v21, %v61_v20 }
  0x3d   :  { %v64_v23 = vmul.f32 0.03125, %v63_v22 }
  0x3f   :  { %v65_v24 = vsub.f32 %v46_v5, %v64_v23  ;;  %v66_v25 = vsub.f32 %v47_v6, %v64_v23  ;;  %v67_v26 = vsub.f32 %v48_v8, %v64_v23  ;;  %v68_v27 = vsub.f32 %v49_v9, %v64_v23 }
  0x41   :  { %v69_v28 = vmul.f32 %v65_v24, %v65_v24  ;;  %v70_v29 = vmul.f32 %v66_v25, %v66_v25  ;;  %v71_v30 = vmul.f32 %v67_v26, %v67_v26  ;;  %v72_v31 = vmul.f32 %v68_v27, %v68_v27 }
  0x43   :  { %v73_v32 = vsel %vm50_vm0, %v69_v28, 0.0  ;;  %v74_v33 = vsel %vm50_vm0, %v70_v29, 0.0  ;;  %v76_v34 = vsel %vm50_vm0, %v71_v30, 0.0  ;;  %v78_v36 = vsel %vm50_vm0, %v72_v31, 0.0 }
  0x44   :  { %v75_v35 = vadd.f32 %v74_v33, %v73_v32 }
  0x46   :  { %v77_v37 = vadd.f32 %v76_v34, %v75_v35 }
  0x48   :  { %v79_v38 = vadd.f32 %v78_v36, %v77_v37 }
  0x4a   :  { %v80_v39 = vrot.slane %v79_v38, 4 }
  0x4c   :  { %v81_v40 = vadd.f32 %v80_v39, %v79_v38 }
  0x4e   :  { %v82_v41 = vrot.slane %v81_v40, 2 }
  0x50   :  { %v83_v42 = vadd.f32 %v82_v41, %v81_v40 }
  0x52   :  { %v84_v43 = vrot.slane %v83_v42, 1 }
  0x54   :  { %v85_v44 = vadd.f32 %v84_v43, %v83_v42 }
  0x56   :  { %v86_v45 = vmul.f32 0.03125, %v85_v44 }
  0x58   :  { %v87_v46 = vadd.f32 1e-05, %v86_v45 }
  0x5a   :  { %527 = vrsqrt.f32 %v87_v46 }
  0x64   :  { %v528_v47 = vpop.eup %527 }
  0x65   :  { %v89_v48 = vmul.f32 %v528_v47, %v65_v24  ;;  %v91_v49 = vmul.f32 %v528_v47, %v67_v26  ;;  %v90_v50 = vmul.f32 %v528_v47, %v66_v25  ;;  %v92_v51 = vmul.f32 %v528_v47, %v68_v27 }
  0x67   :  { %499 = vmatprep.mubr.msk.f32.mxu0 %vm50_vm0, %v89_v48  ;;  %502 = vmatprep.mubr.msk.f32.mxu1 %vm50_vm0, %v91_v49 }
  0x68   :  { %500 = vmatmul.mubr.msk.f32.vlgmr.msra.gmra.mrb[0].mxu0 %vm50_vm0, %v90_v50  ;;  %503 = vmatmul.mubr.msk.f32.vlgmr.msra.gmra.mrb[0].mxu1 %vm50_vm0, %v92_v51 }
 0x13b   :  { %v501_v53 = vpop.f32.mrb[0].mxu0  ;;  %v504_v54 = vpop.f32.mrb[0].mxu1 }
 0x13c   :  { %v182_v55 = vpop.f32.mrb[1].mxu0  ;;  %v192_v56 = vpop.f32.mrb[1].mxu1  ;;  %v740_v57 = vadd.f32 %v504_v54, %v474_v52  ;;  %v746_v60 = vadd.f32 %v501_v53, %v474_v52 }
 0x13d   :  { %v742_v58 = vadd.f32 %v474_v52, %v182_v55  ;;  %v744_v59 = vadd.f32 %v474_v52, %v192_v56 }
 0x13e   :  { %v235_v63 = vsel %vm225_vm1, %v740_v57, -inf  ;;  %v229_v0 = vsel %vm225_vm1, %v746_v60, -inf }
 0x13f   :  { %v232_v61 = vsel %vm225_vm1, %v744_v59, -inf  ;;  %v226_v62 = vsel %vm225_vm1, %v742_v58, -inf }
 0x140   :  { %233 = vmax.xlane.f32.xlu1 %v232_v61  ;;  %227 = vmax.xlane.f32.xlu0 %v226_v62 }
 0x144   :  { %236 = vmax.xlane.f32.xlu1 %v235_v63  ;;  %230 = vmax.xlane.f32.xlu0 %v229_v0 }
 0x1cd   :  { %v228_v1 = vpop.xlane.xlu0 %227  ;;  %v234_v2 = vpop.xlane.xlu1 %233 }
 0x1ce   :  { %v238_v3 = vsub.f32 %v742_v58, %v228_v1  ;;  %v240_v7 = vsub.f32 %v744_v59, %v234_v2 }
 0x1d0   :  { %v242_v4 = vmul.f32 1.442695, %v238_v3  ;;  %v246_v10 = vmul.f32 1.442695, %v240_v7 }
 0x1d1   :  { %v231_v5 = vpop.xlane.xlu0 %230  ;;  %v237_v8 = vpop.xlane.xlu1 %236 }
 0x1d2   :  { %v239_v6 = vsub.f32 %v746_v60, %v231_v5  ;;  %529 = vpow2.f32 %v242_v4  ;;  %v241_v11 = vsub.f32 %v740_v57, %v237_v8 }
 0x1d4   :  { %v244_v9 = vmul.f32 1.442695, %v239_v6  ;;  %v248_v12 = vmul.f32 1.442695, %v241_v11  ;;  %v479_v6 = vmul.f32 -1.442695, %v742_v58 }
 0x1d5   :  { %v482_v58 = vmul.f32 -1.442695, %v740_v57 }
 0x1d6   :  { %531 = vpow2.f32 %v244_v9  ;;  %v480_v9 = vmul.f32 -1.442695, %v746_v60 }
 0x1d7   :  { %533 = vpow2.f32 %v246_v10 }
 0x1d8   :  { %535 = vpow2.f32 %v248_v12 }
 0x1dc   :  { %v530_v13 = vpop.eup %529 }
 0x1dd   :  { %254 = vrot.lane.b32.xlu0 %v530_v13, %s665_s2 }
 0x1e0   :  { %v532_v14 = vpop.eup %531 }
 0x1e1   :  { %256 = vrot.lane.b32.xlu1 %v532_v14, %s665_s2  ;;  %v534_v15 = vpop.eup %533 }
 0x1e2   :  { %v536_v16 = vpop.eup %535 }
 0x1e5   :  { %258 = vrot.lane.b32.xlu1 %v534_v15, %s665_s2 }
 0x1e9   :  { %260 = vrot.lane.b32.xlu1 %v536_v16, %s665_s2 }
 0x24f   :  { %v255_v17 = vpop.permute.xlu0 %254 }
 0x250   :  { %v267_v18 = vsel %vm266_vm2, %v255_v17, 0.0 }
 0x251   :  { %268 = vadd.xlane.f32.xlu0 %v267_v18 }
 0x253   :  { %v257_v19 = vpop.permute.xlu1 %256 }
 0x254   :  { %v270_v20 = vsel %vm266_vm2, %v257_v19, 0.0 }
 0x255   :  { %271 = vadd.xlane.f32.xlu1 %v270_v20 }
 0x257   :  { %v259_v21 = vpop.permute.xlu1 %258 }
 0x258   :  { %v273_v22 = vsel %vm266_vm2, %v259_v21, 0.0 }
 0x259   :  { %274 = vadd.xlane.f32.xlu0 %v273_v22 }
 0x25b   :  { %v261_v23 = vpop.permute.xlu1 %260 }
 0x25c   :  { %v276_v24 = vsel %vm266_vm2, %v261_v23, 0.0 }
 0x25d   :  { %277 = vadd.xlane.f32.xlu0 %v276_v24 }
 0x2de   :  { %v269_v25 = vpop.xlane.xlu0 %268 }
 0x2df   :  { %537 = vrcp.f32 %v269_v25 }
 0x2e2   :  { %v272_v26 = vpop.xlane.xlu1 %271 }
 0x2e3   :  { %539 = vrcp.f32 %v272_v26 }
 0x2e6   :  { %v275_v27 = vpop.xlane.xlu0 %274 }
 0x2e7   :  { %541 = vrcp.f32 %v275_v27 }
 0x2e9   :  { %v538_v28 = vpop.eup %537 }
 0x2ea   :  { %v278_v29 = vpop.xlane.xlu0 %277  ;;  %v280_v30 = vmul.f32 %v538_v28, %v530_v13 }
 0x2eb   :  { %543 = vrcp.f32 %v278_v29 }
 0x2ec   :  { %v287_v31 = vmax.f32 %v280_v30, 1e-07 }
 0x2ed   :  { %v540_v32 = vpop.eup %539 }
 0x2ee   :  { %v291_v33 = vmin.f32 %v287_v31, 1.0  ;;  %v282_v34 = vmul.f32 %v540_v32, %v532_v14 }
 0x2f0   :  { %299 = vrot.lane.b32.xlu0 %v291_v33, %s665_s2  ;;  %v288_v35 = vmax.f32 %v282_v34, 1e-07  ;;  %v333_v39 = vsel %vm225_vm1, %v291_v33, 0.0 }
 0x2f1   :  { %v542_v36 = vpop.eup %541 }
 0x2f2   :  { %v292_v37 = vmin.f32 %v288_v35, 1.0  ;;  %v284_v38 = vmul.f32 %v542_v36, %v534_v15 }
 0x2f4   :  { %301 = vrot.lane.b32.xlu1 %v292_v37, %s665_s2  ;;  %v334_v40 = vsel %vm225_vm1, %v292_v37, 0.0  ;;  %v289_v41 = vmax.f32 %v284_v38, 1e-07 }
 0x2f5   :  { %v544_v42 = vpop.eup %543  ;;  %v335_v43 = vadd.f32 %v334_v40, %v333_v39 }
 0x2f6   :  { %v286_v44 = vmul.f32 %v544_v42, %v536_v16  ;;  %v293_v47 = vmin.f32 %v289_v41, 1.0  ;;  %v481_v16 = vmul.f32 -1.442695, %v744_v59 }
 0x2f7   :  { %v336_v45 = vrot.slane %v335_v43, 4 }
 0x2f8   :  { %v290_v46 = vmax.f32 %v286_v44, 1e-07  ;;  %v342_v52 = vsel %vm225_vm1, %v293_v47, 0.0 }
 0x2f9   :  { %v337_v48 = vadd.f32 %v336_v45, %v335_v43 }
 0x2fa   :  { %v294_v49 = vmin.f32 %v290_v46, 1.0 }
 0x2fb   :  { %v338_v50 = vrot.slane %v337_v48, 2 }
 0x2fc   :  { %305 = vrot.lane.b32.xlu1 %v294_v49, %s665_s2  ;;  %v343_v51 = vsel %vm225_vm1, %v294_v49, 0.0 }
 0x2fd   :  { %v344_v53 = vadd.f32 %v343_v51, %v342_v52  ;;  %v339_v54 = vadd.f32 %v338_v50, %v337_v48 }
 0x2ff   :  { %v345_v55 = vrot.slane %v344_v53, 4  ;;  %v340_v56 = vrot.slane %v339_v54, 1 }
 0x300   :  { %303 = vrot.lane.b32.xlu1 %v293_v47, %s665_s2 }
 0x301   :  { %v346_v61 = vadd.f32 %v345_v55, %v344_v53  ;;  %v341_v62 = vadd.f32 %v340_v56, %v339_v54 }
 0x303   :  { %v347_v63 = vrot.slane %v346_v61, 2  ;;  %545 = vrcp.f32 %v341_v62 }
 0x305   :  { %v348_v0 = vadd.f32 %v347_v63, %v346_v61 }
 0x307   :  { %v349_v1 = vrot.slane %v348_v0, 1 }
 0x309   :  { %v350_v2 = vadd.f32 %v349_v1, %v348_v0 }
 0x30b   :  { %547 = vrcp.f32 %v350_v2 }
 0x30c   :  { %549 = vpow2.f32 %v479_v6 }
 0x30d   :  { %v546_v3 = vpop.eup %545  ;;  %551 = vpow2.f32 %v480_v9 }
 0x30e   :  { %v353_v4 = vmul.f32 %v546_v3, %v341_v62 }
 0x310   :  { %v355_v5 = vsub.f32 2.0, %v353_v4 }
 0x312   :  { %v357_v7 = vmul.f32 %v546_v3, %v355_v5 }
 0x314   :  { %361 = vrot.lane.b32.xlu0 %v357_v7, %s665_s2 }
 0x315   :  { %v548_v8 = vpop.eup %547 }
 0x316   :  { %v354_v10 = vmul.f32 %v548_v8, %v350_v2  ;;  %v550_v13 = vpop.eup %549 }
 0x317   :  { %v213_v14 = vadd.f32 1.0, %v550_v13  ;;  %v552_v15 = vpop.eup %551 }
 0x318   :  { %v356_v11 = vsub.f32 2.0, %v354_v10  ;;  %v214_v17 = vadd.f32 1.0, %v552_v15 }
 0x319   :  { %553 = vrcp.f32 %v213_v14 }
 0x31a   :  { %v358_v12 = vmul.f32 %v548_v8, %v356_v11  ;;  %555 = vpow2.f32 %v481_v16 }
 0x31b   :  { %557 = vrcp.f32 %v214_v17 }
 0x31c   :  { %363 = vrot.lane.b32.xlu1 %v358_v12, %s665_s2  ;;  %559 = vpow2.f32 %v482_v58 }
 0x323   :  { %v554_v60 = vpop.eup %553 }
 0x324   :  { %v556_v18 = vpop.eup %555 }
 0x325   :  { %v558_v19 = vpop.eup %557  ;;  %v215_v20 = vadd.f32 1.0, %v556_v18 }
 0x326   :  { %v560_v21 = vpop.eup %559 }
 0x327   :  { %v216_v22 = vadd.f32 1.0, %v560_v21  ;;  %561 = vrcp.f32 %v215_v20 }
 0x329   :  { %563 = vrcp.f32 %v216_v22 }
 0x331   :  { %v562_v23 = vpop.eup %561 }
 0x332   :  { %372 = vxpose.xlu0.b32.start [1/2] (short) (narrow) %v554_v60, 16 }
 0x333   :  { %v564_v59 = vpop.eup %563 }
 0x336   :  { %373 = vxpose.xlu0.b32.end [2/2] (short) (narrow) %v558_v19, 16 }
 0x345   :  { %404 = vxpose.xlu1.b32.start [1/2] (short) (narrow) %v562_v23, 16 }
 0x349   :  { %405 = vxpose.xlu1.b32.end [2/2] (short) (narrow) %v564_v59, 16 }
 0x362   :  { %v300_v24 = vpop.permute.xlu0 %299 }
 0x363   :  { %v311_v25 = vmul.f32 %v554_v60, %v300_v24 }
 0x365   :  { %v315_v27 = vsel %vm266_vm2, %v311_v25, 0.0 }
 0x366   :  { %v302_v57 = vpop.permute.xlu1 %301 }
 0x367   :  { %v312_v26 = vmul.f32 %v558_v19, %v302_v57 }
 0x369   :  { %v316_v28 = vsel %vm266_vm2, %v312_v26, 0.0 }
 0x36a   :  { %v317_v29 = vadd.f32 %v316_v28, %v315_v27 }
 0x36c   :  { %v318_v31 = vrot.slane %v317_v29, 4 }
 0x36e   :  { %v306_v30 = vpop.permute.xlu1 %305  ;;  %v319_v35 = vadd.f32 %v318_v31, %v317_v29 }
 0x36f   :  { %v314_v32 = vmul.f32 %v564_v59, %v306_v30 }
 0x370   :  { %v320_v40 = vrot.slane %v319_v35, 2 }
 0x371   :  { %v325_v36 = vsel %vm266_vm2, %v314_v32, 0.0 }
 0x372   :  { %v304_v33 = vpop.permute.xlu1 %303  ;;  %v321_v42 = vadd.f32 %v320_v40, %v319_v35 }
 0x373   :  { %v313_v34 = vmul.f32 %v562_v23, %v304_v33 }
 0x374   :  { %v322_v43 = vrot.slane %v321_v42, 1 }
 0x375   :  { %v324_v37 = vsel %vm266_vm2, %v313_v34, 0.0 }
 0x376   :  { %v326_v38 = vadd.f32 %v325_v36, %v324_v37  ;;  %v323_v45 = vadd.f32 %v322_v43, %v321_v42 }
 0x378   :  { %v327_v39 = vrot.slane %v326_v38, 4 }
 0x37a   :  { %v328_v41 = vadd.f32 %v327_v39, %v326_v38 }
 0x37c   :  { %v329_v44 = vrot.slane %v328_v41, 2 }
 0x37e   :  { %v330_v46 = vadd.f32 %v329_v44, %v328_v41 }
 0x380   :  { %v331_v49 = vrot.slane %v330_v46, 1 }
 0x382   :  { %v332_v50 = vadd.f32 %v331_v49, %v330_v46 }
 0x386   :  { %v362_v47 = vpop.permute.xlu0 %361 }
 0x387   :  { %v367_v48 = vmul.f32 %v362_v47, %v323_v45 }
 0x389   :  { %370 = vst.msk [vmem:[#allocation8] sm:$0x1] %vm369_vm3, %v367_v48 }
 0x38e   :  { %v364_v51 = vpop.permute.xlu1 %363 }
 0x38f   :  { %v368_v52 = vmul.f32 %v364_v51, %v332_v50 }
 0x391   :  { %371 = vst.msk [vmem:[#allocation8 + $0x1] sm:$0x1] %vm369_vm3, %v368_v52 }
 0x392   :  { %620 = shalt.err (!%p617_p6)
}
 0x393   :  { %s621_s20 = scalar_lea.hbm %s821_s4, 32 }
 0x394   :  { %p622_p7 = scmp.ne.s32.totalorder %s821_s4, %s621_s20  ;;  %p625_p8 = scmp.lt.u32.totalorder %s621_s20, %s821_s4 }
 0x396   :  { %p627_p9 = pnand %p625_p8, %p622_p7 }
 0x398   :  { %630 = shalt.err (!%p627_p9)
}
 0x399   :  { %s667_s27 = smov 16   ;;  %s668_s28 = smov 1  }
 0x39a   :  { %463 = dma.vmem_to_hbm [thread:$0]  %s458_s16, 32, %s821_s4, [#allocation9], %s667_s27, %s667_s27, %s668_s28  }
 0x39b   :  { %s669_s5 = smov [#allocation7]  }
 0x39c   :  { %s445_s6 = sshll.u32 %s669_s5, 4  ;;  %s446_s6 = int_to_ptr.vmem [resolvable:$true] %s445_s6 }
 0x39d   :  { %s631_s7 = scalar_lea.vmem %s446_s6, 512  ;;  %p636_p11 = scmp.lt.s32.totalorder %s446_s6, %s446_s6 }
 0x39e   :  { %p632_p10 = scmp.ne.s32.totalorder %s446_s6, %s631_s7  ;;  %p637_p12 = scmp.lt.s32.totalorder %s631_s7, %s631_s7 }
 0x3a0   :  { %p638_p13 = por %p637_p12, %p636_p11 }
 0x3a2   :  { %p639_p0 = pnand %p638_p13, %p632_p10 }
 0x3b2   :  { %v388_v53 = vpop.trf.xlu0 }
 0x3b3   :  { %436 = vst.msk [vmem:[#allocation7] sm:$0xff] %vm266_vm2, %v388_v53 }
 0x3b6   :  { %v389_v54 = vpop.trf.xlu0 }
 0x3b7   :  { %437 = vst.msk [vmem:[#allocation7 + $0x8] sm:$0xff] %vm266_vm2, %v389_v54 }
 0x3c5   :  { %v420_v55 = vpop.trf.xlu1 }
 0x3c6   :  { %438 = vst.msk [vmem:[#allocation7 + $0x10] sm:$0xff] %vm266_vm2, %v420_v55 }
 0x3c9   :  { %v421_v56 = vpop.trf.xlu1 }
 0x3ca   :  { %439 = vst.msk [vmem:[#allocation7 + $0x18] sm:$0xff] %vm266_vm2, %v421_v56 }
 0x3cb   :  { %642 = shalt.err (!%p639_p0)
}
 0x3cc   :  { %s643_s9 = scalar_lea.hbm %s820_s3, 512 }
 0x3cd   :  { %p644_p1 = scmp.ne.s32.totalorder %s820_s3, %s643_s9  ;;  %p647_p2 = scmp.lt.u32.totalorder %s643_s9, %s820_s3 }
 0x3cf   :  { %p649_p3 = pnand %p647_p2, %p644_p1 }
 0x3d1   :  { %652 = shalt.err (!%p649_p3)
}
 0x3d2   :  { %451 = dma.vmem_to_hbm [thread:$0]  %s446_s6, 512, %s820_s3, [#allocation4], %s662_s25, %s662_s25, %s663_s26  }
 0x3d3   :  { %657 = dma.done.wait [#allocation4], 512  }
 0x3d4   :  { %658 = vsyncadd [#allocation4], 4294966784 }
 0x3d5   :  { %659 = dma.done.wait [#allocation9], 32  }
 0x3d6   :  { %660 = vsyncadd [#allocation9], 4294967264 }
 0x3d7   :  { %470 = vsyncpa [#allocation3], 1 }
 0x3d8   :  { %471 = vsyncpa [#allocation6], 1 }
 0x3d9   :  { %472 = vsyncpa [#allocation4], 1 }
 0x3da   :  { %473 = vsyncpa [#allocation9], 1 }

</bundles_post_ra>
